<compile_context>
chip_gen: v5e
topology: v5e:2x2
jax: 0.10.0
libtpu: 0.0.40
codegen_flags: <defaults>
</compile_context>

<pallas_src>
import jax
import jax.numpy as jnp
from jax.experimental import pallas as pl
from jax.experimental.pallas import tpu as pltpu

# ----------------------------- model dims (small) ---------------------------
B = 2          # batch
S = 64         # sequence length (>1 required: mean is over S-1 tokens)
H = 32         # hidden size
SEQ_TILE = 16  # explicit small tile in the demo to exercise the multi-tile path
VOCAB = 100    # synthetic vocab for the stand-in encoder


# ------------------------------- Pallas kernel ------------------------------
def make_ledrm_head_kernel(seq_len, seq_tile):
    """Build the head kernel for a fixed total sequence length / tile."""
    inv_kept = 1.0 / float(seq_len - 1)   # static 1/(S-1)

    def kernel(h_ref, w_ref, b_ref, o_ref, acc_ref):
        # h_ref  : [1, tS, H]  bf16 (or f32) sequence tile of one batch row (VMEM)
        # w_ref  : [1, H]      f32 value_head weight (VMEM)
        # b_ref  : [1]         f32 value_head bias (SMEM scalar)
        # o_ref  : [1, 1, 128] f32 lane-dense per-sequence reward block
        # acc_ref: [1, H]      f32 running sum over sequence tiles (VMEM scratch)
        t = pl.program_id(1)   # sequence (reduction) axis — sequential / arbitrary

        @pl.when(t == 0)
        def _init():
            acc_ref[...] = jnp.zeros_like(acc_ref)

        # Accumulate the bf16 stream in f32 (sublane reduce on the VPU).
        acc_ref[...] += jnp.sum(h_ref[...].astype(jnp.float32), axis=1)   # [1, H]

        @pl.when(t == pl.num_programs(1) - 1)
        def _finalize():
            # Drop the last token by subtracting its contribution (it lives in
            # the final tile at local index seq_tile - 1).
            last = h_ref[:, seq_tile - 1, :].astype(jnp.float32)          # [1, H]
            kept = acc_ref[...] - last                                    # [1, H]
            # mean over S-1 of (h @ w + b) == (sum_{s<S-1} h) @ w / (S-1) + b
            val = jnp.sum(kept * w_ref[...], axis=-1) * inv_kept + b_ref[0]  # [1]
            # Lane-dense unmasked store: broadcast the scalar across 128 lanes.
            o_ref[...] = jnp.broadcast_to(val.reshape(1, 1, 1), o_ref.shape)

    return kernel


def _pick_seq_tile(s, h, itemsize, *, sublane, vmem_budget_bytes=12 << 20):
    """Largest multiple-of-`sublane` divisor of s whose double-buffered
    [1, tile, h] input block fits the VMEM budget (safe on every generation)."""
    if 2 * s * h * itemsize <= vmem_budget_bytes:
        return s
    max_tile = max(sublane, vmem_budget_bytes // (2 * h * itemsize))
    best = None
    t = sublane
    while t <= min(s, max_tile):
        if s % t == 0:
            best = t
        t += sublane
    return best if best is not None else s


def ledrm_value_head(last_hidden_states, vh_weight, vh_bias, *, seq_tile=None):
    """last_hidden_states: [B, S, H] (bf16 preferred); vh_weight: [H]; vh_bias: []."""
    b, s, h = last_hidden_states.shape
    assert s > 1, "LEDRM head needs at least 2 tokens (mean over S-1 positions)"

    itemsize = jnp.dtype(last_hidden_states.dtype).itemsize
    sublane = 16 if itemsize == 2 else 8          # bf16 packs 2 rows per sublane
    if seq_tile is None:
        seq_tile = _pick_seq_tile(s, h, itemsize, sublane=sublane)
    assert s % seq_tile == 0, "sequence length must be divisible by seq_tile"
    assert seq_tile == s or seq_tile % sublane == 0, (
        f"seq_tile must be a multiple of {sublane} for dtype "
        f"{last_hidden_states.dtype} (or equal to the full sequence length)")
    n_tiles = s // seq_tile

    w2d = vh_weight.reshape(1, h).astype(jnp.float32)
    b1d = vh_bias.reshape(1).astype(jnp.float32)

    # The head is pure HBM streaming: tell XLA how big it is.
    cost = pl.CostEstimate(
        flops=2 * b * s * h,
        transcendentals=0,
        bytes_accessed=b * s * h * itemsize + h * 4 + b * 128 * 4,
    )

    out = pl.pallas_call(
        make_ledrm_head_kernel(s, seq_tile),
        out_shape=jax.ShapeDtypeStruct((b, 1, 128), jnp.float32),
        grid=(b, n_tiles),
        in_specs=[
            # Hidden states streamed in their native dtype; double-buffered.
            pl.BlockSpec((1, seq_tile, h), lambda bi, t: (bi, t, 0)),
            # Value-head weight: one small VMEM row, same block every step.
            pl.BlockSpec((1, h), lambda bi, t: (0, 0)),
            # Bias: scalar in SMEM (no padded VMEM tile, no vld slot).
            pl.BlockSpec(memory_space=pltpu.MemorySpace.SMEM),
        ],
        # Same output block across the reduction axis -> resident accumulator,
        # written only at the final sequence step of each batch row.
        out_specs=pl.BlockSpec((1, 1, 128), lambda bi, t: (bi, 0, 0)),
        scratch_shapes=[pltpu.VMEM((1, h), jnp.float32)],
        compiler_params=pltpu.CompilerParams(
            # Batch axis parallel (engages both TCs on v7x; harmless elsewhere);
            # sequence axis is the reduction -> keep it last and "arbitrary".
            dimension_semantics=("parallel", "arbitrary"),
            # Explicit scoped-VMEM cap: safe on v7x (<= physical 64 MiB) and
            # lifts v5e's 16 MiB default so large tiles keep double-buffering.
            vmem_limit_bytes=32 << 20,
        ),
        cost_estimate=cost,
    )(last_hidden_states, w2d, b1d)

    return out[:, 0, 0]                           # -> [B]


# --------------------- synthetic stand-in for the backbone ------------------
# TODO(synk): LongformerModel.from_pretrained('longformer_clinical/') has no
# Pallas equivalent in-script; replaced by a deterministic embedding encoder
# that emits backbone-native bf16 activations.
def synthetic_encoder(sequences, attention_mask, emb_table):
    hdn = emb_table[sequences]                                    # [B, S, H] f32
    hdn = jnp.tanh(hdn) * attention_mask[..., None].astype(jnp.float32)
    return hdn.astype(jnp.bfloat16)                               # bf16 stream


# ------------------------------------ main -----------------------------------
if __name__ == "__main__":
    key = jax.random.PRNGKey(0)
    k_seq, k_emb, k_w, k_b = jax.random.split(key, 4)

    # Inputs (mirrors forward(sequences: LongTensor, attention_mask)).
    sequences = jax.random.randint(k_seq, (B, S), 0, VOCAB, dtype=jnp.int32)
    attention_mask = jnp.ones((B, S), dtype=jnp.int32)

    # Deterministic parameter init.
    emb_table = jax.random.normal(k_emb, (VOCAB, H), dtype=jnp.float32) * 0.02
    # value_head.weight ~ Normal(0, 1/(hidden_size + 1)); bias ~ default Linear init.
    vh_weight = jax.random.normal(k_w, (H,), dtype=jnp.float32) * (1.0 / (H + 1))
    vh_bias = jax.random.uniform(
        k_b, (), dtype=jnp.float32, minval=-1.0 / jnp.sqrt(H), maxval=1.0 / jnp.sqrt(H)
    )

    # Forward pass (explicit small seq_tile to exercise the multi-tile /
    # multi-batch grid path; the default picks the largest tile that fits VMEM).
    last_hidden_states = synthetic_encoder(sequences, attention_mask, emb_table)
    value = ledrm_value_head(last_hidden_states, vh_weight, vh_bias, seq_tile=SEQ_TILE)
    value = jax.block_until_ready(value)

    # Reference (plain JAX) check of the head semantics on the same bf16 stream.
    hdn_f32 = last_hidden_states.astype(jnp.float32)
    ref_vals = hdn_f32 @ vh_weight + vh_bias                       # [B, S]
    ref = ref_vals[:, :-1].mean(axis=1)                            # [B]
    assert value.shape == (B,)
    assert jnp.allclose(value, ref, atol=1e-5, rtol=1e-5), (value, ref)

    print("KERNEL_OK")
</pallas_src>

<mosaic_0001>
module attributes {stable_mosaic.version = 11 : i64} {
  func.func @kernel(%arg0: i32, %arg1: i32, %arg2: memref<1x16x32xbf16, #tpu.memory_space<vmem>>, %arg3: memref<1x32xf32, #tpu.memory_space<vmem>>, %arg4: memref<1xf32, #tpu.memory_space<smem>>, %arg5: memref<1x1x128xf32, #tpu.memory_space<vmem>>, %arg6: memref<1x32xf32, #tpu.memory_space<vmem>>) attributes {dimension_semantics = [#tpu.dimension_semantics<parallel>, #tpu.dimension_semantics<arbitrary>], iteration_bounds = array<i64: 2, 4>, scalar_prefetch = 0 : i64, scratch_operands = 1 : i64, tpu.core_type = #tpu.core_type<tc>, window_params = [{transform_indices = @transform_0, window_bounds = array<i64: 1, 16, 32>}, {pipeline_mode = #tpu.pipeline_mode<synchronous>, transform_indices = @transform_1, window_bounds = array<i64: 1, 32>}, {transform_indices = @transform_2, window_bounds = array<i64: 1>}, {transform_indices = @transform_3, window_bounds = array<i64: 1, 1, 128>}]} {
    %c0_i32 = arith.constant 0 : i32
    %0 = arith.cmpi eq, %arg1, %c0_i32 : i32
    %1 = arith.extui %0 : i1 to i32
    %c0_i32_0 = arith.constant 0 : i32
    %2 = arith.cmpi ne, %1, %c0_i32_0 : i32
    scf.if %2 {
      %cst_8 = arith.constant 0.000000e+00 : f32
      %12 = vector.broadcast %cst_8 : f32 to vector<1x32xf32>
      %c0_9 = arith.constant 0 : index
      %c0_10 = arith.constant 0 : index
      %13 = vector.load %arg6[%c0_9, %c0_10] : memref<1x32xf32, #tpu.memory_space<vmem>>, vector<1x32xf32>
      tpu.vector_store %arg6[%c0_9, %c0_10], %12 {strides = array<i32>} : memref<1x32xf32, #tpu.memory_space<vmem>>, vector<1x32xf32>,
    } else {
    }
    %c0 = arith.constant 0 : index
    %c0_1 = arith.constant 0 : index
    %3 = vector.load %arg6[%c0, %c0_1] : memref<1x32xf32, #tpu.memory_space<vmem>>, vector<1x32xf32>
    %c0_2 = arith.constant 0 : index
    %c0_3 = arith.constant 0 : index
    %c0_4 = arith.constant 0 : index
    %4 = vector.load %arg2[%c0_2, %c0_3, %c0_4] : memref<1x16x32xbf16, #tpu.memory_space<vmem>>, vector<1x16x32xbf16>
    %5 = arith.extf %4 : vector<1x16x32xbf16> to vector<1x16x32xf32>
    %cst = arith.constant dense<0.000000e+00> : vector<1x32xf32>
    %6 = vector.multi_reduction <add>, %5, %cst [1] : vector<1x16x32xf32> to vector<1x32xf32>
    %7 = arith.addf %3, %6 : vector<1x32xf32>
    %c0_5 = arith.constant 0 : index
    %c0_6 = arith.constant 0 : index
    %8 = vector.load %arg6[%c0_5, %c0_6] : memref<1x32xf32, #tpu.memory_space<vmem>>, vector<1x32xf32>
    tpu.vector_store %arg6[%c0_5, %c0_6], %7 {strides = array<i32>} : memref<1x32xf32, #tpu.memory_space<vmem>>, vector<1x32xf32>,
    %c3_i32 = arith.constant 3 : i32
    %9 = arith.cmpi eq, %arg1, %c3_i32 : i32
    %10 = arith.extui %9 : i1 to i32
    %c0_i32_7 = arith.constant 0 : i32
    %11 = arith.cmpi ne, %10, %c0_i32_7 : i32
    scf.if %11 {
      %c0_8 = arith.constant 0 : index
      %c15 = arith.constant 15 : index
      %c0_9 = arith.constant 0 : index
      %12 = vector.load %arg2[%c0_8, %c15, %c0_9] : memref<1x16x32xbf16, #tpu.memory_space<vmem>>, vector<1x1x32xbf16>
      %13 = vector.shape_cast %12 : vector<1x1x32xbf16> to vector<1x32xbf16>
      %14 = arith.extf %13 : vector<1x32xbf16> to vector<1x32xf32>
      %c0_10 = arith.constant 0 : index
      %c0_11 = arith.constant 0 : index
      %15 = vector.load %arg6[%c0_10, %c0_11] : memref<1x32xf32, #tpu.memory_space<vmem>>, vector<1x32xf32>
      %16 = arith.subf %15, %14 : vector<1x32xf32>
      %c0_12 = arith.constant 0 : index
      %c0_13 = arith.constant 0 : index
      %17 = vector.load %arg3[%c0_12, %c0_13] : memref<1x32xf32, #tpu.memory_space<vmem>>, vector<1x32xf32>
      %18 = arith.mulf %16, %17 : vector<1x32xf32>
      %cst_14 = arith.constant dense<0.000000e+00> : vector<1xf32>
      %19 = vector.multi_reduction <add>, %18, %cst_14 [1] : vector<1x32xf32> to vector<1xf32>
      %cst_15 = arith.constant 0.0158730168 : f32
      %20 = vector.broadcast %cst_15 : f32 to vector<1xf32>
      %21 = arith.mulf %19, %20 : vector<1xf32>
      %c0_16 = arith.constant 0 : index
      %22 = memref.load %arg4[%c0_16] : memref<1xf32, #tpu.memory_space<smem>>
      %23 = vector.broadcast %22 : f32 to vector<1xf32>
      %24 = arith.addf %21, %23 : vector<1xf32>
      %25 = vector.shape_cast %24 : vector<1xf32> to vector<1x1x1xf32>
      %26 = vector.shape_cast %25 : vector<1x1x1xf32> to vector<1x1x1xf32>
      %27 = vector.broadcast %26 : vector<1x1x1xf32> to vector<1x1x128xf32>
      %c0_17 = arith.constant 0 : index
      %c0_18 = arith.constant 0 : index
      %c0_19 = arith.constant 0 : index
      %28 = vector.load %arg5[%c0_17, %c0_18, %c0_19] : memref<1x1x128xf32, #tpu.memory_space<vmem>>, vector<1x1x128xf32>
      tpu.vector_store %arg5[%c0_17, %c0_18, %c0_19], %27 {strides = array<i32>} : memref<1x1x128xf32, #tpu.memory_space<vmem>>, vector<1x1x128xf32>,
    } else {
    }
    return
  }
  func.func @transform_0(%arg0: i32, %arg1: i32) -> (i32, i32, i32) {
    %c0_i32 = arith.constant 0 : i32
    %c0_i32_0 = arith.constant 0 : i32
    return %arg0, %arg1, %c0_i32 : i32, i32, i32
  }
  func.func @transform_1(%arg0: i32, %arg1: i32) -> (i32, i32) {
    %c0_i32 = arith.constant 0 : i32
    %c0_i32_0 = arith.constant 0 : i32
    %c0_i32_1 = arith.constant 0 : i32
    return %c0_i32, %c0_i32_0 : i32, i32
  }
  func.func @transform_2(%arg0: i32, %arg1: i32) -> i32 {
    %c0_i32 = arith.constant 0 : i32
    %c0_i32_0 = arith.constant 0 : i32
    return %c0_i32 : i32
  }
  func.func @transform_3(%arg0: i32, %arg1: i32) -> (i32, i32, i32) {
    %c0_i32 = arith.constant 0 : i32
    %c0_i32_0 = arith.constant 0 : i32
    %c0_i32_1 = arith.constant 0 : i32
    return %arg0, %c0_i32, %c0_i32_0 : i32, i32, i32
  }
}

</mosaic_0001>

<bundles_post_ra>
// kernel: tpu_custom_call.1
= control target key start
LH: loop header
LB: loop body
LE: loop exit
PB: predicated region body
PF: predicated region fallthrough
CT: control target
= control target key end

     0   :  { %s668_s0 = inlined_call_operand.vmem [shape: bf16[2,64,32], index: 0, kind: input, shape index: {}]   ;;  %s669_s1 = inlined_call_operand.vmem [shape: f32[1,32], index: 1, kind: input, shape index: {}]   ;;  %s670_s2 = inlined_call_operand.<no memory space> [shape: f32[1], index: 2, kind: input, shape index: {}]   ;;  %s671_s3 = inlined_call_operand.hbm [shape: f32[2,1,128], index: 3, kind: output, shape index: {}]  }
   0x1   :  { %8 = sst [smem:[#allocation3]] %s670_s2 }
   0x2   :  { %9 = vsyncpa [#allocation5], 0 }
   0x3   :  { %11 = vsyncpa [#allocation5 + $0x1], 0  ;;  %s537_s14 = smov 0   ;;  %s539_s15 = smov 0  }
   0x4   :  { %s541_s16 = smov 0   ;;  %s543_s17 = smov 0  }
   0x5   :  { %s545_s18 = smov 0   ;;  %s547_s19 = smov 0  }
   0x6   :  { %s549_s20 = smov 0   ;;  %s551_s21 = smov 0  }
   0x7 LB: > { %s329_s2 = sadd.s32 4294967295, %s511_s21   ;;  %s330_s22 = sadd.s32 4294967294, %s511_s21   ;;  %s511_s21 = sphi %s551_s21, %s17_s21   ;;  %s507_s20 = sphi %s549_s20, %s680_s20   ;;  %s503_s19 = sphi %s547_s19, %s679_s19   ;;  %s499_s18 = sphi %s545_s18, %s678_s18   ;;  %s495_s17 = sphi %s543_s17, %s677_s17   ;;  %s491_s16 = sphi %s541_s16, %s676_s16   ;;  %s487_s15 = sphi %s539_s15, %s675_s15   ;;  %s483_s14 = sphi %s537_s14, %s674_s14  }
   0x8   : > { %s26_s23 = sadd.s32 1, %s503_s19  ;;  %s29_s24 = sadd.s32 1, %s507_s20 }
   0x9   : > { %p27_p0 = scmp.ge.s32.totalorder %s26_s23, 4  ;;  %p116_p1 = scmp.ne.s32.totalorder %s491_s16, %s487_s15 }
   0xa   : > { %p117_p2 = scmp.eq.s32.totalorder %s329_s2, 7  ;;  %p122_p4 = scmp.ne.s32.totalorder %s487_s15, %s483_s14 }
   0xb   : > { %s682_s23 = smov (%p27_p0, %s26_s23), 0  ;;  %s684_s24 = smov (!%p27_p0, %s29_s24), %s507_s20 }
   0xc   : > { %p586_p3 = por %p117_p2, %p116_p1  ;;  %p31_p5 = scmp.ge.s32.totalorder %s684_s24, 2 }
   0xd   : > { %p123_p6 = scmp.eq.s32.totalorder %s330_s22, 7  ;;  %p333_p7 = scmp.ge.s32.totalorder %s511_s21, 1 }
   0xe   : > { %p160_p8 = scmp.lt.s32.totalorder %s511_s21, 9  ;;  %s686_s24 = smov (%p31_p5, %s684_s24), 0 }
   0xf   : > { %p596_p9 = por %p123_p6, %p122_p4  ;;  %s103_s27 = ssub.s32 %s507_s20, %s686_s24 }
  0x10   : > { %p161_p10 = pnand %p333_p7, %p160_p8  ;;  %s106_s28 = sadd.s32 1, %s491_s16 }
  0x11   : > { %p104_p11 = scmp.eq.s32.totalorder %s103_s27, 0  ;;  %s185_s30 = sand.u32 (!%p161_p10), 1, %s487_s15  }
  0x12   : > { %164 = sbr.rel (%p161_p10) target bundleno = 203 (0xcb), region = 32  ;;  %s334_s4 = sshll.u32 (!%p161_p10), %s495_s17, 1 }
  0x13   : > { %s604_s29 = scalar_select %p104_p11, %s491_s16, %s106_s28  }
  0x14   : > { %p188_p12 = scmp.lt.s32.totalorder (!%p161_p10), %s499_s18, 1  ;;  %p190_p13 = scmp.lt.s32.totalorder (!%p161_p10), %s334_s4, 7 }
  0x15   : > { %s615_s12 = scalar_lea.vmem (!%p161_p10), [#allocation4], %s185_s30  ;;  %p337_p0 = scmp.ne.s32.totalorder (!%p161_p10), %s495_s17, 0 }
  0x17   : > { %s189_s5 = scalar_select %p188_p12, %s499_s18, 1 }
  0x18   : > { %s688_s4 = smov (!%p190_p13, %s334_s4), 7  ;;  %200 = sbr.rel (%p337_p0) target bundleno = 31 (0x1f), region = 36 }
  0x19   : > { %s335_s6 = sshll.u32 %s189_s5, 3 }
  0x1a   : > { %s193_s7 = sadd.s32 %s335_s6, %s688_s4 }
  0x1b   : > { %s336_s8 = sshll.u32 %s193_s7, 2 }
  0x1c   : > { %s195_s11 = scalar_lea.vmem %s668_s0, %s336_s8 }
  0x1d   : > { %vm201_vm0 = vcmask 253952   ;;  %v513_v0 = vmov 0.0  }
  0x1e   : > { %202 = vst.msk [vmem:[#allocation2] sm:$0x1] %vm201_vm0, %v513_v0 }
  0x1f PF: > { %v342_v1 = vld [vmem:[%s195_s11] sm:$0xff]   ;;  %vm208_vm1 = vcmask 261120   ;;  %vm219_vm2 = vcmask 253952   ;;  %p338_p1 = scmp.ne.s32.totalorder %s495_s17, 3 }
  0x20   : > { %v343_v2 = vunpack.c.l.bf16 %v342_v1  ;;  %v344_v3 = vunpack.c.h.bf16 %v342_v1  ;;  %s240_s22 = sld [smem:[#allocation3]] (!%p338_p1) }
  0x22   : > { %v209_v4 = vsel %vm208_vm1, %v343_v2, 0.0  ;;  %v210_v5 = vsel %vm208_vm1, %v344_v3, 0.0 }
  0x23   : > { %v211_v6 = vadd.f32 %v210_v5, %v209_v4 }
  0x25   : > { %v212_v7 = vrot.slane %v211_v6, 4  ;;  %v203_v12 = vld [vmem:[#allocation2] sm:$0x1] }
  0x27   : > { %v213_v8 = vadd.f32 %v212_v7, %v211_v6 }
  0x29   : > { %v214_v9 = vrot.slane %v213_v8, 2 }
  0x2b   : > { %v215_v10 = vadd.f32 %v214_v9, %v213_v8 }
  0x2d   : > { %v216_v11 = vrot.slane %v215_v10, 1 }
  0x2f   : > { %v217_v13 = vadd.f32 %v216_v11, %v215_v10  ;;  %224 = sbr.rel (%p338_p1) target bundleno = 189 (0xbd), region = 40 }
  0x31   : > { %v218_v14 = vadd.f32 %v217_v13, %v203_v12 }
  0x33   : > { %220 = vst.msk [vmem:[#allocation2] sm:$0x1] %vm219_vm2, %v218_v14 }
  0x34   : > { %v225_v15 = vld [vmem:[%s195_s11 + $0x4] sm:$0x8]  ;;  %v234_v19 = vld [vmem:[%s669_s1] sm:$0x1]  ;;  %v241_v24 = vstv %s240_s22 }
  0x35   : > { %v226_v16 = vunpack.c.l.bf16 %v225_v15 }
  0x37   : > { %229 = vst [vmem:[#allocation1] sm:$0xff] %v226_v16 }
  0x3a   : > { %v227_v17 = vld [vmem:[#allocation2] sm:$0x1] }
  0x3e   : > { %v231_v18 = vld [vmem:[#allocation1 + $0x7] ss:$9 sm:$0xff] }
  0x3f   : > { %v233_v20 = vsub.f32 %v227_v17, %v231_v18 }
  0x41   : > { %v235_v21 = vmul.f32 %v234_v19, %v233_v20 }
  0x43   : > { %v236_v22 = vsel %vm219_vm2, %v235_v21, 0.0 }
  0x44   : > { %237 = vadd.xlane.f32.xlu0 %v236_v22 }
  0xb7   : > { %v238_v23 = vpop.xlane.xlu0 %237 }
  0xb8   : > { %v239_v25 = vmul.f32 0.015873017, %v238_v23 }
  0xba   : > { %v242_v26 = vadd.f32 %v241_v24, %v239_v25 }
  0xbc   : > { %243 = vst [vmem:[%s615_s12] sm:$0x1] %v242_v26 }
  0xbd PF: > { %s253_s28 = scalar_lea.hbm %s671_s3, %s499_s18  ;;  %s255_s4 = sshll.u32 %s615_s12, 4  ;;  %s256_s4 = int_to_ptr.vmem [resolvable:$true] %s255_s4 }
  0xbe   : > { %s257_s5 = sshll.u32 %s253_s28, 4  ;;  %s245_s6 = scalar_lea.sflag [#allocation5], %s185_s30  ;;  %s258_s5 = int_to_ptr.hbm [resolvable:$true] %s257_s5 }
  0xbf   : > { %s431_s7 = sshra.s32 %s258_s5, 4  ;;  %s437_s11 = scalar_lea.hbm %s671_s3, 2  ;;  %s432_s7 = int_to_ptr.hbm [resolvable:$true] %s431_s7 }
  0xc0   : > { %s433_s8 = scalar_lea.hbm %s432_s7, 1  ;;  %p438_p6 = scmp.lt.s32.totalorder %s432_s7, %s671_s3 }
  0xc1   : > { %p434_p2 = scmp.ne.s32.totalorder %s432_s7, %s433_s8  ;;  %p439_p7 = scmp.lt.s32.totalorder %s437_s11, %s433_s8 }
  0xc3   : > { %p435_p4 = pnand %p434_p2, %p586_p3  ;;  %p440_p8 = por %p439_p7, %p438_p6 }
  0xc5   : > { %p436_p5 = pneg %p435_p4 }
  0xc7   : > { %p441_p10 = pnand %p440_p8, %p436_p5 }
  0xc9   : > { %444 = shalt.err (!%p441_p10)
}
  0xca   : > { %345 = dma.vmem_to_hbm [thread:$0]  (%p586_p3), %s256_s4, 16, %s258_s5, %s245_s6  }
  0xcb PF: > { %p351_p11 = scmp.ge.s32.totalorder %s511_s21, 2  ;;  %s269_s18 = sand.u32 1, %s483_s14  }
  0xcc   : > { %s270_s30 = scalar_lea.sflag [#allocation5], %s269_s18 }
  0xcd   : > { %p348_p12 = pnand %p351_p11, %p596_p9 }
  0xcf   : > { %p349_p13 = pneg %p348_p12 }
  0xd1   : > { %478 = dma.done.wait (%p349_p13), %s270_s30, 16  }
  0xd2   : > { %480 = vsyncadd (%p349_p13), %s270_s30, 4294967280  ;;  %s17_s21 = sadd.s32 1, %s511_s21   ;;  %s674_s14 = smov %s487_s15 }
  0xd3   : > { %p14_p0 = scmp.ge.s32.totalorder %s17_s21, 10   ;;  %s675_s15 = smov %s491_s16 }
  0xd4   : > { %s676_s16 = smov %s604_s29  ;;  %s677_s17 = smov %s503_s19 }
  0xd5   : > { %s678_s18 = smov %s507_s20  ;;  %s679_s19 = smov %s682_s23 }
  0xd6   : > { %s680_s20 = smov %s686_s24  ;;  %16 = sbr.rel (!%p14_p0) target bundleno = 7 (0x7), region = 76 }
  0xdb   :  { %275 = vsyncpa [#allocation5], 1 }
  0xdc   :  { %277 = vsyncpa [#allocation5 + $0x1], 1 }

</bundles_post_ra>
